<compile_context>
chip_gen: v7x
topology: tpu7x:2x2x1
jax: 0.10.0
libtpu: 0.0.40
codegen_flags: <defaults>
</compile_context>

<pallas_src>
import functools

import jax
import jax.numpy as jnp
from jax.experimental import pallas as pl
from jax.experimental.pallas import tpu as pltpu


def _round_up(x, m):
    return (x + m - 1) // m * m


def _layernorm_silu(x, gamma, beta, eps=1e-3):
    # LayerNorm over last dim (biased variance, like nn.LayerNorm), then SiLU.
    mean = jnp.mean(x, axis=-1, keepdims=True)
    var = jnp.mean((x - mean) ** 2, axis=-1, keepdims=True)
    xn = (x - mean) * jax.lax.rsqrt(var + eps)
    y = xn * gamma + beta
    return y * jax.nn.sigmoid(y)


# ---------------------------------------------------------------------------
# Kernel A: h-independent pre-pass, batched over all T*B rows.
#   gi = W_ih @ LayerNormSiLU(Linear2(LayerNormSiLU(Linear1([z|a])))) + b_ih
# Output layout: (M, 3*hp) with 128-lane-aligned gate tiles [r_i | z_i | n_i].
# ---------------------------------------------------------------------------
def _gi_kernel(z_ref, a_ref, w1z_ref, w1a_ref, ln_ref, w2_ref, wih_ref, bih_ref,
               gi_ref):
    z = z_ref[...].astype(jnp.float32)          # (TM, z_dim)
    a = a_ref[...].astype(jnp.float32)          # (TM, a_dim)
    # za_fcs: [Linear -> LayerNorm(1e-3) -> SiLU] x 2 (w1 pre-split, no concat)
    x = (jnp.dot(z, w1z_ref[...], preferred_element_type=jnp.float32)
         + jnp.dot(a, w1a_ref[...], preferred_element_type=jnp.float32)
         + ln_ref[0:1, :])
    x = _layernorm_silu(x, ln_ref[1:2, :], ln_ref[2:3, :])
    x = jnp.dot(x, w2_ref[...], preferred_element_type=jnp.float32) + ln_ref[3:4, :]
    x = _layernorm_silu(x, ln_ref[4:5, :], ln_ref[5:6, :])
    # Input-side GRU gate pre-activations for this row block.
    gi_ref[...] = (jnp.dot(x, wih_ref[...], preferred_element_type=jnp.float32)
                   + bih_ref[...])


# ---------------------------------------------------------------------------
# Kernel B: serial GRU recurrence; whole T loop inside one kernel invocation.
# Per step only h @ W_hh + elementwise gates sit on the critical path.
# ---------------------------------------------------------------------------
def _recurrence_kernel(T, B, hp, h_dim, gi_ref, h0_ref, whh_ref, bhh_ref, out_ref):
    whh = whh_ref[...]                          # (hp, 3*hp), resident
    bhh = bhh_ref[...]                          # (1, 3*hp)

    def step(t, h):
        row = pl.multiple_of(t * B, B)
        gi_t = gi_ref[pl.ds(row, B), :]         # (B, 3*hp) VMEM load
        gh = jnp.dot(h, whh, preferred_element_type=jnp.float32) + bhh
        r = jax.nn.sigmoid(gi_t[:, 0 * hp:1 * hp] + gh[:, 0 * hp:1 * hp])
        zg = jax.nn.sigmoid(gi_t[:, 1 * hp:2 * hp] + gh[:, 1 * hp:2 * hp])
        n = jnp.tanh(gi_t[:, 2 * hp:3 * hp] + r * gh[:, 2 * hp:3 * hp])
        h_new = (1.0 - zg) * n + zg * h         # padded lanes stay 0 (see header)
        out_ref[t] = h_new[:, :h_dim].astype(out_ref.dtype)
        return h_new

    jax.lax.fori_loop(0, T, step, h0_ref[...].astype(jnp.float32),
                      unroll=(T <= 16))


def _pack_params(params, z_dim, h_dim, hp):
    """Pack the logical (torch-like) params into the kernel operand layout."""
    mlp = params["w2"].shape[0]
    w1 = params["w1"]
    w1_z, w1_a = w1[:z_dim], w1[z_dim:]
    ln = jnp.stack([params["b1"], params["g1"], params["be1"],
                    params["b2"], params["g2"], params["be2"]], axis=0)  # (6, mlp)

    H = h_dim
    w_ih, w_hh = params["w_ih"], params["w_hh"]
    b_ih, b_hh = params["b_ih"], params["b_hh"]

    # Gate tiles, each 128-lane aligned (real width H), order r, z, n.
    wih = jnp.zeros((mlp, 3 * hp), jnp.float32)
    whh = jnp.zeros((hp, 3 * hp), jnp.float32)
    bih = jnp.zeros((1, 3 * hp), jnp.float32)
    bhh = jnp.zeros((1, 3 * hp), jnp.float32)
    for g in range(3):
        wih = wih.at[:, g * hp:g * hp + H].set(w_ih[:, g * H:(g + 1) * H])
        whh = whh.at[:H, g * hp:g * hp + H].set(w_hh[:, g * H:(g + 1) * H])
        bih = bih.at[0, g * hp:g * hp + H].set(b_ih[g * H:(g + 1) * H])
        bhh = bhh.at[0, g * hp:g * hp + H].set(b_hh[g * H:(g + 1) * H])
    return w1_z, w1_a, ln, params["w2"], wih, bih, whh, bhh


def recurrent_rollout(z_seq, a_seq, h0, params):
    """Apply the Recurrent step T times.

    z_seq: (T, B, ls0, ls1) or (T, B, z_dim);  a_seq: (T, B, a_dim);  h0: (B, h_dim).
    Returns (T, B, h_dim): the hidden state after each step.
    """
    T, B = z_seq.shape[0], z_seq.shape[1]
    z_seq = z_seq.reshape(T, B, -1)
    z_dim = z_seq.shape[-1]
    a_dim = a_seq.shape[-1]
    h_dim = h0.shape[-1]
    mlp = params["w2"].shape[0]
    hp = _round_up(h_dim, 128)      # 128-lane-aligned gate tiles

    w1_z, w1_a, ln, w2, wih, bih, whh, bhh = _pack_params(params, z_dim, h_dim, hp)

    # ---- Kernel A: batched pre-pass over M = T*B rows ----
    M = T * B
    TM = min(512, _round_up(M, 8))
    Mp = _round_up(M, TM)
    z_flat = z_seq.reshape(M, z_dim).astype(jnp.float32)
    a_flat = a_seq.reshape(M, a_dim).astype(jnp.float32)
    if Mp > M:
        z_flat = jnp.pad(z_flat, ((0, Mp - M), (0, 0)))
        a_flat = jnp.pad(a_flat, ((0, Mp - M), (0, 0)))

    flops_a = 2 * Mp * (z_dim * mlp + a_dim * mlp + mlp * mlp + mlp * 3 * hp)
    bytes_a = 4 * (z_flat.size + a_flat.size + w1_z.size + w1_a.size + ln.size
                   + w2.size + wih.size + bih.size + Mp * 3 * hp)
    gi = pl.pallas_call(
        _gi_kernel,
        out_shape=jax.ShapeDtypeStruct((Mp, 3 * hp), jnp.float32),
        grid=(Mp // TM,),
        in_specs=[
            pl.BlockSpec((TM, z_dim), lambda m: (m, 0)),         # per-block rows
            pl.BlockSpec((TM, a_dim), lambda m: (m, 0)),
            pl.BlockSpec((z_dim, mlp), lambda m: (0, 0)),        # weights: constant
            pl.BlockSpec((a_dim, mlp), lambda m: (0, 0)),        #   block index ->
            pl.BlockSpec((6, mlp), lambda m: (0, 0)),            #   VMEM-resident
            pl.BlockSpec((mlp, mlp), lambda m: (0, 0)),
            pl.BlockSpec((mlp, 3 * hp), lambda m: (0, 0)),
            pl.BlockSpec((1, 3 * hp), lambda m: (0, 0)),
        ],
        out_specs=pl.BlockSpec((TM, 3 * hp), lambda m: (m, 0)),
        compiler_params=pltpu.CompilerParams(
            dimension_semantics=("parallel",)),   # independent rows -> both TCs (v7x)
        cost_estimate=pl.CostEstimate(
            flops=int(flops_a),
            transcendentals=int(Mp * (2 * mlp + 4)),
            bytes_accessed=int(bytes_a)),
    )(z_flat, a_flat, w1_z, w1_a, ln, w2, wih, bih)

    # ---- Kernel B: serial recurrence, everything VMEM-resident, no grid ----
    h0_pad = jnp.pad(h0.astype(jnp.float32), ((0, 0), (0, hp - h_dim)))

    flops_b = 2 * T * B * hp * 3 * hp + 12 * T * B * hp
    bytes_b = 4 * (gi.size + h0_pad.size + whh.size + bhh.size + T * B * h_dim)
    out = pl.pallas_call(
        functools.partial(_recurrence_kernel, T, B, hp, h_dim),
        out_shape=jax.ShapeDtypeStruct((T, B, h_dim), h0.dtype),
        cost_estimate=pl.CostEstimate(
            flops=int(flops_b),
            transcendentals=int(3 * T * B * hp),
            bytes_accessed=int(bytes_b)),
    )(gi, h0_pad, whh, bhh)
    return out


def recurrent_forward(prev_z, prev_a, prev_h, params):
    """Single step, matching the PyTorch module's forward exactly."""
    assert prev_z.ndim == 3
    assert prev_a.ndim == 2
    return recurrent_rollout(prev_z[None], prev_a[None], prev_h, params)[0]


def init_params(key, in_dim, mlp_features, h_dim):
    ks = jax.random.split(key, 8)

    def uni(k, shape, fan_in):
        bound = 1.0 / jnp.sqrt(fan_in)
        return jax.random.uniform(k, shape, jnp.float32, -bound, bound)

    return {
        # Linear 1: (in_dim -> mlp), stored (in, out)
        "w1": uni(ks[0], (in_dim, mlp_features), in_dim),
        "b1": uni(ks[1], (mlp_features,), in_dim),
        "g1": jnp.ones((mlp_features,), jnp.float32),
        "be1": jnp.zeros((mlp_features,), jnp.float32),
        # Linear 2: (mlp -> mlp)
        "w2": uni(ks[2], (mlp_features, mlp_features), mlp_features),
        "b2": uni(ks[3], (mlp_features,), mlp_features),
        "g2": jnp.ones((mlp_features,), jnp.float32),
        "be2": jnp.zeros((mlp_features,), jnp.float32),
        # GRUCell: weight_ih (mlp -> 3h), weight_hh (h -> 3h), gate order r, z, n
        "w_ih": uni(ks[4], (mlp_features, 3 * h_dim), h_dim),
        "w_hh": uni(ks[5], (h_dim, 3 * h_dim), h_dim),
        "b_ih": uni(ks[6], (3 * h_dim,), h_dim),
        "b_hh": uni(ks[7], (3 * h_dim,), h_dim),
    }


def recurrent_reference(prev_z, prev_a, prev_h, params):
    # Pure-JAX reference of the module semantics (for validation).
    B = prev_z.shape[0]
    za = jnp.concatenate([prev_z.reshape(B, -1), prev_a], axis=1)
    x = za @ params["w1"] + params["b1"]
    x = _layernorm_silu(x, params["g1"], params["be1"])
    x = x @ params["w2"] + params["b2"]
    x = _layernorm_silu(x, params["g2"], params["be2"])
    gi = x @ params["w_ih"] + params["b_ih"]
    gh = prev_h @ params["w_hh"] + params["b_hh"]
    H = prev_h.shape[-1]
    r = jax.nn.sigmoid(gi[:, :H] + gh[:, :H])
    z = jax.nn.sigmoid(gi[:, H:2 * H] + gh[:, H:2 * H])
    n = jnp.tanh(gi[:, 2 * H:] + r * gh[:, 2 * H:])
    return (1.0 - z) * n + z * prev_h


if __name__ == "__main__":
    # Small shapes consistent with the module: ls=(4, 8) -> z_dim=32, a_dim=8,
    # h_dim=32, mlp_features=64, mlp_layers=2, batch=8, rollout length T=8.
    B = 8
    LS = (4, 8)
    A_DIM = 8
    H_DIM = 32
    MLP_FEATURES = 64
    T = 8
    z_dim = LS[0] * LS[1]
    in_dim = z_dim + A_DIM

    key = jax.random.PRNGKey(0)
    k_z, k_a, k_h, k_p = jax.random.split(key, 4)
    z_seq = jax.random.normal(k_z, (T, B, LS[0], LS[1]), jnp.float32)
    a_seq = jax.random.normal(k_a, (T, B, A_DIM), jnp.float32)
    h0 = jax.random.normal(k_h, (B, H_DIM), jnp.float32)
    params = init_params(k_p, in_dim, MLP_FEATURES, H_DIM)

    # Single-step forward (the module's exact interface).
    out1 = recurrent_forward(z_seq[0], a_seq[0], h0, params)
    out1 = jax.block_until_ready(out1)
    ref1 = recurrent_reference(z_seq[0], a_seq[0], h0, params)
    assert out1.shape == (B, H_DIM)
    assert jnp.allclose(out1, ref1, atol=1e-4, rtol=1e-4), "single-step mismatch"

    # Multi-step rollout (hoisted pre-pass + in-kernel time loop).
    h_seq = recurrent_rollout(z_seq, a_seq, h0, params)
    h_seq = jax.block_until_ready(h_seq)
    ref_h = h0
    ref_steps = []
    for t in range(T):
        ref_h = recurrent_reference(z_seq[t], a_seq[t], ref_h, params)
        ref_steps.append(ref_h)
    ref_seq = jnp.stack(ref_steps, axis=0)
    assert h_seq.shape == (T, B, H_DIM)
    assert jnp.allclose(h_seq, ref_seq, atol=1e-4, rtol=1e-4), "rollout mismatch"

    print("KERNEL_OK")
</pallas_src>

<mosaic_0001>
module attributes {stable_mosaic.version = 11 : i64} {
  func.func @_gi_kernel(%arg0: i32, %arg1: memref<8x32xf32, #tpu.memory_space<vmem>>, %arg2: memref<8x8xf32, #tpu.memory_space<vmem>>, %arg3: memref<32x64xf32, #tpu.memory_space<vmem>>, %arg4: memref<8x64xf32, #tpu.memory_space<vmem>>, %arg5: memref<6x64xf32, #tpu.memory_space<vmem>>, %arg6: memref<64x64xf32, #tpu.memory_space<vmem>>, %arg7: memref<64x384xf32, #tpu.memory_space<vmem>>, %arg8: memref<1x384xf32, #tpu.memory_space<vmem>>, %arg9: memref<8x384xf32, #tpu.memory_space<vmem>>) attributes {dimension_semantics = [#tpu.dimension_semantics<parallel>], iteration_bounds = array<i64: 1>, scalar_prefetch = 0 : i64, scratch_operands = 0 : i64, tpu.core_type = #tpu.core_type<tc>, window_params = [{transform_indices = @transform_0, window_bounds = array<i64: 8, 32>}, {transform_indices = @transform_1, window_bounds = array<i64: 8, 8>}, {pipeline_mode = #tpu.pipeline_mode<synchronous>, transform_indices = @transform_2, window_bounds = array<i64: 32, 64>}, {pipeline_mode = #tpu.pipeline_mode<synchronous>, transform_indices = @transform_3, window_bounds = array<i64: 8, 64>}, {pipeline_mode = #tpu.pipeline_mode<synchronous>, transform_indices = @transform_4, window_bounds = array<i64: 6, 64>}, {pipeline_mode = #tpu.pipeline_mode<synchronous>, transform_indices = @transform_5, window_bounds = array<i64: 64, 64>}, {pipeline_mode = #tpu.pipeline_mode<synchronous>, transform_indices = @transform_6, window_bounds = array<i64: 64, 384>}, {pipeline_mode = #tpu.pipeline_mode<synchronous>, transform_indices = @transform_7, window_bounds = array<i64: 1, 384>}, {transform_indices = @transform_8, window_bounds = array<i64: 8, 384>}]} {
    %c0 = arith.constant 0 : index
    %c0_0 = arith.constant 0 : index
    %0 = vector.load %arg1[%c0, %c0_0] : memref<8x32xf32, #tpu.memory_space<vmem>>, vector<8x32xf32>
    %c0_1 = arith.constant 0 : index
    %c0_2 = arith.constant 0 : index
    %1 = vector.load %arg2[%c0_1, %c0_2] : memref<8x8xf32, #tpu.memory_space<vmem>>, vector<8x8xf32>
    %c0_3 = arith.constant 0 : index
    %c0_4 = arith.constant 0 : index
    %2 = vector.load %arg3[%c0_3, %c0_4] : memref<32x64xf32, #tpu.memory_space<vmem>>, vector<32x64xf32>
    %cst = arith.constant dense<0.000000e+00> : vector<8x64xf32>
    %3 = tpu.matmul %0, %2, %cst {dimension_numbers = #tpu.dot_dimension_numbers<[1], [0], [0], [1], [0, 0, 1, 1], [], []>} : vector<8x32xf32>, vector<32x64xf32>, vector<8x64xf32> -> vector<8x64xf32>
    %c0_5 = arith.constant 0 : index
    %c0_6 = arith.constant 0 : index
    %4 = vector.load %arg4[%c0_5, %c0_6] : memref<8x64xf32, #tpu.memory_space<vmem>>, vector<8x64xf32>
    %cst_7 = arith.constant dense<0.000000e+00> : vector<8x64xf32>
    %5 = tpu.matmul %1, %4, %cst_7 {dimension_numbers = #tpu.dot_dimension_numbers<[1], [0], [0], [1], [0, 0, 1, 1], [], []>} : vector<8x8xf32>, vector<8x64xf32>, vector<8x64xf32> -> vector<8x64xf32>
    %6 = arith.addf %3, %5 : vector<8x64xf32>
    %c0_8 = arith.constant 0 : index
    %c0_9 = arith.constant 0 : index
    %7 = vector.load %arg5[%c0_8, %c0_9] : memref<6x64xf32, #tpu.memory_space<vmem>>, vector<1x64xf32>
    %8 = vector.broadcast %7 : vector<1x64xf32> to vector<8x64xf32>
    %9 = arith.addf %6, %8 : vector<8x64xf32>
    %c1 = arith.constant 1 : index
    %c0_10 = arith.constant 0 : index
    %10 = vector.load %arg5[%c1, %c0_10] : memref<6x64xf32, #tpu.memory_space<vmem>>, vector<1x64xf32>
    %c2 = arith.constant 2 : index
    %c0_11 = arith.constant 0 : index
    %11 = vector.load %arg5[%c2, %c0_11] : memref<6x64xf32, #tpu.memory_space<vmem>>, vector<1x64xf32>
    %cst_12 = arith.constant dense<0.000000e+00> : vector<8xf32>
    %12 = vector.multi_reduction <add>, %9, %cst_12 [1] : vector<8x64xf32> to vector<8xf32>
    %13 = vector.shape_cast %12 : vector<8xf32> to vector<8x1xf32>
    %cst_13 = arith.constant 6.400000e+01 : f32
    %14 = vector.broadcast %cst_13 : f32 to vector<8x1xf32>
    %15 = arith.divf %13, %14 : vector<8x1xf32>
    %16 = vector.broadcast %15 : vector<8x1xf32> to vector<8x64xf32>
    %17 = arith.subf %9, %16 : vector<8x64xf32>
    %18 = arith.mulf %17, %17 : vector<8x64xf32>
    %cst_14 = arith.constant dense<0.000000e+00> : vector<8xf32>
    %19 = vector.multi_reduction <add>, %18, %cst_14 [1] : vector<8x64xf32> to vector<8xf32>
    %20 = vector.shape_cast %19 : vector<8xf32> to vector<8x1xf32>
    %cst_15 = arith.constant 6.400000e+01 : f32
    %21 = vector.broadcast %cst_15 : f32 to vector<8x1xf32>
    %22 = arith.divf %20, %21 : vector<8x1xf32>
    %23 = vector.broadcast %15 : vector<8x1xf32> to vector<8x64xf32>
    %24 = arith.subf %9, %23 : vector<8x64xf32>
    %cst_16 = arith.constant 1.000000e-03 : f32
    %25 = vector.broadcast %cst_16 : f32 to vector<8x1xf32>
    %26 = arith.addf %22, %25 : vector<8x1xf32>
    %27 = math.rsqrt %26 : vector<8x1xf32>
    %28 = vector.broadcast %27 : vector<8x1xf32> to vector<8x64xf32>
    %29 = arith.mulf %24, %28 : vector<8x64xf32>
    %30 = vector.broadcast %10 : vector<1x64xf32> to vector<8x64xf32>
    %31 = arith.mulf %29, %30 : vector<8x64xf32>
    %32 = vector.broadcast %11 : vector<1x64xf32> to vector<8x64xf32>
    %33 = arith.addf %31, %32 : vector<8x64xf32>
    %34 = arith.negf %33 : vector<8x64xf32>
    %35 = math.exp %34 : vector<8x64xf32>
    %cst_17 = arith.constant 1.000000e+00 : f32
    %36 = vector.broadcast %cst_17 : f32 to vector<8x64xf32>
    %37 = arith.addf %36, %35 : vector<8x64xf32>
    %38 = arith.divf %36, %37 : vector<8x64xf32>
    %39 = arith.mulf %33, %38 : vector<8x64xf32>
    %c0_18 = arith.constant 0 : index
    %c0_19 = arith.constant 0 : index
    %40 = vector.load %arg6[%c0_18, %c0_19] : memref<64x64xf32, #tpu.memory_space<vmem>>, vector<64x64xf32>
    %cst_20 = arith.constant dense<0.000000e+00> : vector<8x64xf32>
    %41 = tpu.matmul %39, %40, %cst_20 {dimension_numbers = #tpu.dot_dimension_numbers<[1], [0], [0], [1], [0, 0, 1, 1], [], []>} : vector<8x64xf32>, vector<64x64xf32>, vector<8x64xf32> -> vector<8x64xf32>
    %c3 = arith.constant 3 : index
    %c0_21 = arith.constant 0 : index
    %42 = vector.load %arg5[%c3, %c0_21] : memref<6x64xf32, #tpu.memory_space<vmem>>, vector<1x64xf32>
    %43 = vector.broadcast %42 : vector<1x64xf32> to vector<8x64xf32>
    %44 = arith.addf %41, %43 : vector<8x64xf32>
    %c4 = arith.constant 4 : index
    %c0_22 = arith.constant 0 : index
    %45 = vector.load %arg5[%c4, %c0_22] : memref<6x64xf32, #tpu.memory_space<vmem>>, vector<1x64xf32>
    %c5 = arith.constant 5 : index
    %c0_23 = arith.constant 0 : index
    %46 = vector.load %arg5[%c5, %c0_23] : memref<6x64xf32, #tpu.memory_space<vmem>>, vector<1x64xf32>
    %cst_24 = arith.constant dense<0.000000e+00> : vector<8xf32>
    %47 = vector.multi_reduction <add>, %44, %cst_24 [1] : vector<8x64xf32> to vector<8xf32>
    %48 = vector.shape_cast %47 : vector<8xf32> to vector<8x1xf32>
    %cst_25 = arith.constant 6.400000e+01 : f32
    %49 = vector.broadcast %cst_25 : f32 to vector<8x1xf32>
    %50 = arith.divf %48, %49 : vector<8x1xf32>
    %51 = vector.broadcast %50 : vector<8x1xf32> to vector<8x64xf32>
    %52 = arith.subf %44, %51 : vector<8x64xf32>
    %53 = arith.mulf %52, %52 : vector<8x64xf32>
    %cst_26 = arith.constant dense<0.000000e+00> : vector<8xf32>
    %54 = vector.multi_reduction <add>, %53, %cst_26 [1] : vector<8x64xf32> to vector<8xf32>
    %55 = vector.shape_cast %54 : vector<8xf32> to vector<8x1xf32>
    %cst_27 = arith.constant 6.400000e+01 : f32
    %56 = vector.broadcast %cst_27 : f32 to vector<8x1xf32>
    %57 = arith.divf %55, %56 : vector<8x1xf32>
    %58 = vector.broadcast %50 : vector<8x1xf32> to vector<8x64xf32>
    %59 = arith.subf %44, %58 : vector<8x64xf32>
    %cst_28 = arith.constant 1.000000e-03 : f32
    %60 = vector.broadcast %cst_28 : f32 to vector<8x1xf32>
    %61 = arith.addf %57, %60 : vector<8x1xf32>
    %62 = math.rsqrt %61 : vector<8x1xf32>
    %63 = vector.broadcast %62 : vector<8x1xf32> to vector<8x64xf32>
    %64 = arith.mulf %59, %63 : vector<8x64xf32>
    %65 = vector.broadcast %45 : vector<1x64xf32> to vector<8x64xf32>
    %66 = arith.mulf %64, %65 : vector<8x64xf32>
    %67 = vector.broadcast %46 : vector<1x64xf32> to vector<8x64xf32>
    %68 = arith.addf %66, %67 : vector<8x64xf32>
    %69 = arith.negf %68 : vector<8x64xf32>
    %70 = math.exp %69 : vector<8x64xf32>
    %cst_29 = arith.constant 1.000000e+00 : f32
    %71 = vector.broadcast %cst_29 : f32 to vector<8x64xf32>
    %72 = arith.addf %71, %70 : vector<8x64xf32>
    %73 = arith.divf %71, %72 : vector<8x64xf32>
    %74 = arith.mulf %68, %73 : vector<8x64xf32>
    %c0_30 = arith.constant 0 : index
    %c0_31 = arith.constant 0 : index
    %75 = vector.load %arg7[%c0_30, %c0_31] : memref<64x384xf32, #tpu.memory_space<vmem>>, vector<64x384xf32>
    %cst_32 = arith.constant dense<0.000000e+00> : vector<8x384xf32>
    %76 = tpu.matmul %74, %75, %cst_32 {dimension_numbers = #tpu.dot_dimension_numbers<[1], [0], [0], [1], [0, 0, 1, 1], [], []>} : vector<8x64xf32>, vector<64x384xf32>, vector<8x384xf32> -> vector<8x384xf32>
    %c0_33 = arith.constant 0 : index
    %c0_34 = arith.constant 0 : index
    %77 = vector.load %arg8[%c0_33, %c0_34] : memref<1x384xf32, #tpu.memory_space<vmem>>, vector<1x384xf32>
    %78 = vector.broadcast %77 : vector<1x384xf32> to vector<8x384xf32>
    %79 = arith.addf %76, %78 : vector<8x384xf32>
    %c0_35 = arith.constant 0 : index
    %c0_36 = arith.constant 0 : index
    %80 = vector.load %arg9[%c0_35, %c0_36] : memref<8x384xf32, #tpu.memory_space<vmem>>, vector<8x384xf32>
    tpu.vector_store %arg9[%c0_35, %c0_36], %79 {strides = array<i32>} : memref<8x384xf32, #tpu.memory_space<vmem>>, vector<8x384xf32>,
    return
  }
  func.func @transform_0(%arg0: i32) -> (i32, i32) {
    %c0_i32 = arith.constant 0 : i32
    %c0_i32_0 = arith.constant 0 : i32
    return %arg0, %c0_i32 : i32, i32
  }
  func.func @transform_1(%arg0: i32) -> (i32, i32) {
    %c0_i32 = arith.constant 0 : i32
    %c0_i32_0 = arith.constant 0 : i32
    return %arg0, %c0_i32 : i32, i32
  }
  func.func @transform_2(%arg0: i32) -> (i32, i32) {
    %c0_i32 = arith.constant 0 : i32
    %c0_i32_0 = arith.constant 0 : i32
    %c0_i32_1 = arith.constant 0 : i32
    return %c0_i32, %c0_i32_0 : i32, i32
  }
  func.func @transform_3(%arg0: i32) -> (i32, i32) {
    %c0_i32 = arith.constant 0 : i32
    %c0_i32_0 = arith.constant 0 : i32
    %c0_i32_1 = arith.constant 0 : i32
    return %c0_i32, %c0_i32_0 : i32, i32
  }
  func.func @transform_4(%arg0: i32) -> (i32, i32) {
    %c0_i32 = arith.constant 0 : i32
    %c0_i32_0 = arith.constant 0 : i32
    %c0_i32_1 = arith.constant 0 : i32
    return %c0_i32, %c0_i32_0 : i32, i32
  }
  func.func @transform_5(%arg0: i32) -> (i32, i32) {
    %c0_i32 = arith.constant 0 : i32
    %c0_i32_0 = arith.constant 0 : i32
    %c0_i32_1 = arith.constant 0 : i32
    return %c0_i32, %c0_i32_0 : i32, i32
  }
  func.func @transform_6(%arg0: i32) -> (i32, i32) {
    %c0_i32 = arith.constant 0 : i32
    %c0_i32_0 = arith.constant 0 : i32
    %c0_i32_1 = arith.constant 0 : i32
    return %c0_i32, %c0_i32_0 : i32, i32
  }
  func.func @transform_7(%arg0: i32) -> (i32, i32) {
    %c0_i32 = arith.constant 0 : i32
    %c0_i32_0 = arith.constant 0 : i32
    %c0_i32_1 = arith.constant 0 : i32
    return %c0_i32, %c0_i32_0 : i32, i32
  }
  func.func @transform_8(%arg0: i32) -> (i32, i32) {
    %c0_i32 = arith.constant 0 : i32
    %c0_i32_0 = arith.constant 0 : i32
    return %arg0, %c0_i32 : i32, i32
  }
}

</mosaic_0001>

<bundles_post_ra>
// kernel: tpu_custom_call.1
= control target key start
LH: loop header
LB: loop body
LE: loop exit
PB: predicated region body
PF: predicated region fallthrough
CT: control target
= control target key end

     0   :  { %13 = vsyncpa [#allocation3], 0  ;;  %s1143_s0 = inlined_call_operand.hbm [shape: f32[8,32], index: 0, kind: input, shape index: {}]   ;;  %s1144_s1 = inlined_call_operand.hbm [shape: f32[8,8], index: 1, kind: input, shape index: {}]   ;;  %s1145_s2 = inlined_call_operand.hbm [shape: f32[32,64], index: 2, kind: input, shape index: {}]   ;;  %s1146_s3 = inlined_call_operand.vmem [shape: f32[8,64], index: 3, kind: input, shape index: {}]   ;;  %s1147_s4 = inlined_call_operand.hbm [shape: f32[6,64], index: 4, kind: input, shape index: {}]   ;;  %s1148_s5 = inlined_call_operand.hbm [shape: f32[64,64], index: 5, kind: input, shape index: {}]   ;;  %s1149_s6 = inlined_call_operand.hbm [shape: f32[64,384], index: 6, kind: input, shape index: {}]   ;;  %s1150_s7 = inlined_call_operand.vmem [shape: f32[1,384], index: 7, kind: input, shape index: {}]   ;;  %s1151_s8 = inlined_call_operand.hbm [shape: f32[8,384], index: 8, kind: output, shape index: {}]  }
   0x1   :  { %14 = vsyncpa [#allocation6], 0 }
   0x2   :  { %15 = vsyncpa [#allocation9], 0 }
   0x3   :  { %16 = vsyncpa [#allocation12], 0 }
   0x4   :  { %17 = vsyncpa [#allocation4], 0  ;;  %s953_s27 = smov [#allocation5]   ;;  %s954_s29 = smov [#allocation8]  }
   0x5   :  { %s34_s28 = sshll.u32 %s953_s27, 4  ;;  %s58_s30 = sshll.u32 %s954_s29, 4  ;;  %s35_s28 = int_to_ptr.vmem [resolvable:$true] %s34_s28  ;;  %s59_s30 = int_to_ptr.vmem [resolvable:$true] %s58_s30 }
   0x6   :  { %s789_s11 = scalar_lea.hbm %s1144_s1, 128 }
   0x7   :  { %p790_p0 = scmp.ne.s32.totalorder %s1144_s1, %s789_s11  ;;  %p793_p1 = scmp.lt.u32.totalorder %s789_s11, %s1144_s1 }
   0x9   :  { %p795_p2 = pnand %p793_p1, %p790_p0 }
   0xb   :  { %798 = shalt.err (!%p795_p2)
}
   0xc   :  { %s799_s16 = scalar_lea.vmem %s35_s28, 128  ;;  %p804_p4 = scmp.lt.s32.totalorder %s35_s28, %s35_s28 }
   0xd   :  { %p800_p3 = scmp.ne.s32.totalorder %s35_s28, %s799_s16  ;;  %p805_p5 = scmp.lt.s32.totalorder %s799_s16, %s799_s16 }
   0xf   :  { %p806_p6 = por %p805_p5, %p804_p4 }
  0x11   :  { %p807_p7 = pnand %p806_p6, %p800_p3 }
  0x13   :  { %810 = shalt.err (!%p807_p7)
}
  0x14   :  { %37 = dma.hbm_to_vmem [thread:$0]  %s1144_s1, 128, %s35_s28, [#allocation6]  }
  0x15   :  { %s811_s21 = scalar_lea.hbm %s1147_s4, 128 }
  0x16   :  { %p812_p8 = scmp.ne.s32.totalorder %s1147_s4, %s811_s21  ;;  %p815_p9 = scmp.lt.u32.totalorder %s811_s21, %s1147_s4 }
  0x18   :  { %p817_p10 = pnand %p815_p9, %p812_p8 }
  0x1a   :  { %820 = shalt.err (!%p817_p10)
}
  0x1b   :  { %s821_s26 = scalar_lea.vmem %s59_s30, 128  ;;  %p826_p12 = scmp.lt.s32.totalorder %s59_s30, %s59_s30 }
  0x1c   :  { %p822_p11 = scmp.ne.s32.totalorder %s59_s30, %s821_s26  ;;  %p827_p13 = scmp.lt.s32.totalorder %s821_s26, %s821_s26 }
  0x1e   :  { %p828_p0 = por %p827_p13, %p826_p12 }
  0x20   :  { %p829_p1 = pnand %p828_p0, %p822_p11 }
  0x22   :  { %832 = shalt.err (!%p829_p1)
}
  0x23   :  { %61 = dma.hbm_to_vmem [thread:$0]  %s1147_s4, 128, %s59_s30, [#allocation9]  }
  0x24   :  { %s955_s28 = smov [#allocation2]   ;;  %s956_s9 = smov [#allocation7]  }
  0x25   :  { %s24_s29 = sshll.u32 %s955_s28, 4  ;;  %s43_s10 = sshll.u32 %s956_s9, 4  ;;  %s25_s29 = int_to_ptr.vmem [resolvable:$true] %s24_s29  ;;  %s1036_s10 = int_to_ptr.vmem [resolvable:$true] %s43_s10 }
  0x26   :  { %s833_s13 = scalar_lea.hbm %s1143_s0, 128 }
  0x27   :  { %p834_p2 = scmp.ne.s32.totalorder %s1143_s0, %s833_s13  ;;  %p837_p3 = scmp.lt.u32.totalorder %s833_s13, %s1143_s0 }
  0x29   :  { %p839_p4 = pnand %p837_p3, %p834_p2 }
  0x2b   :  { %842 = shalt.err (!%p839_p4)
}
  0x2c   :  { %s843_s4 = scalar_lea.vmem %s25_s29, 128  ;;  %p848_p6 = scmp.lt.s32.totalorder %s25_s29, %s25_s29 }
  0x2d   :  { %p844_p5 = scmp.ne.s32.totalorder %s25_s29, %s843_s4  ;;  %p849_p7 = scmp.lt.s32.totalorder %s843_s4, %s843_s4 }
  0x2f   :  { %p850_p8 = por %p849_p7, %p848_p6 }
  0x31   :  { %p851_p9 = pnand %p850_p8, %p844_p5 }
  0x33   :  { %854 = shalt.err (!%p851_p9)
}
  0x34   :  { %27 = dma.hbm_to_vmem [thread:$0]  %s1143_s0, 128, %s25_s29, [#allocation3]  }
  0x35   :  { %s855_s21 = scalar_lea.hbm %s1145_s2, 512 }
  0x36   :  { %p856_p10 = scmp.ne.s32.totalorder %s1145_s2, %s855_s21  ;;  %p859_p11 = scmp.lt.u32.totalorder %s855_s21, %s1145_s2 }
  0x38   :  { %p861_p12 = pnand %p859_p11, %p856_p10 }
  0x3a   :  { %864 = shalt.err (!%p861_p12)
}
  0x3b   :  { %s865_s26 = scalar_lea.vmem %s1036_s10, 512  ;;  %p870_p0 = scmp.lt.s32.totalorder %s1036_s10, %s1036_s10 }
  0x3c   :  { %p866_p13 = scmp.ne.s32.totalorder %s1036_s10, %s865_s26  ;;  %p871_p1 = scmp.lt.s32.totalorder %s865_s26, %s865_s26 }
  0x3e   :  { %p872_p2 = por %p871_p1, %p870_p0 }
  0x40   :  { %p873_p3 = pnand %p872_p2, %p866_p13 }
  0x42   :  { %876 = shalt.err (!%p873_p3)
}
  0x43   :  { %s957_s0 = smov 128   ;;  %s958_s1 = smov 8  }
  0x44   :  { %49 = dma.hbm_to_vmem [thread:$0]  %s1145_s2, 512, %s1036_s10, [#allocation6], %s957_s0, %s957_s0, %s958_s1  }
  0x45   :  { %s959_s29 = smov [#allocation10]   ;;  %s960_s11 = smov [#allocation11]  }
  0x46   :  { %s67_s9 = sshll.u32 %s959_s29, 4  ;;  %s79_s12 = sshll.u32 %s960_s11, 4  ;;  %s68_s9 = int_to_ptr.vmem [resolvable:$true] %s67_s9  ;;  %s1067_s12 = int_to_ptr.vmem [resolvable:$true] %s79_s12 }
  0x47   :  { %s877_s15 = scalar_lea.hbm %s1148_s5, 1024 }
  0x48   :  { %p878_p4 = scmp.ne.s32.totalorder %s1148_s5, %s877_s15  ;;  %p881_p5 = scmp.lt.u32.totalorder %s877_s15, %s1148_s5 }
  0x4a   :  { %p883_p6 = pnand %p881_p5, %p878_p4 }
  0x4c   :  { %886 = shalt.err (!%p883_p6)
}
  0x4d   :  { %s887_s2 = scalar_lea.vmem %s68_s9, 1024  ;;  %p892_p8 = scmp.lt.s32.totalorder %s68_s9, %s68_s9 }
  0x4e   :  { %p888_p7 = scmp.ne.s32.totalorder %s68_s9, %s887_s2  ;;  %p893_p9 = scmp.lt.s32.totalorder %s887_s2, %s887_s2 }
  0x50   :  { %p894_p10 = por %p893_p9, %p892_p8 }
  0x52   :  { %p895_p11 = pnand %p894_p10, %p888_p7 }
  0x54   :  { %898 = shalt.err (!%p895_p11)
}
  0x55   :  { %73 = dma.hbm_to_vmem [thread:$0]  %s1148_s5, 1024, %s68_s9, [#allocation9], %s957_s0, %s957_s0, %s958_s1  }
  0x56   :  { %s899_s21 = scalar_lea.hbm %s1149_s6, 3072 }
  0x57   :  { %p900_p12 = scmp.ne.s32.totalorder %s1149_s6, %s899_s21  ;;  %p903_p13 = scmp.lt.u32.totalorder %s899_s21, %s1149_s6 }
  0x59   :  { %p905_p0 = pnand %p903_p13, %p900_p12 }
  0x5b   :  { %908 = shalt.err (!%p905_p0)
}
  0x5c   :  { %s909_s26 = scalar_lea.vmem %s1067_s12, 3072  ;;  %p914_p2 = scmp.lt.s32.totalorder %s1067_s12, %s1067_s12 }
  0x5d   :  { %p910_p1 = scmp.ne.s32.totalorder %s1067_s12, %s909_s26  ;;  %p915_p3 = scmp.lt.s32.totalorder %s909_s26, %s909_s26 }
  0x5f   :  { %p916_p4 = por %p915_p3, %p914_p2 }
  0x61   :  { %p917_p5 = pnand %p916_p4, %p910_p1 }
  0x63   :  { %920 = shalt.err (!%p917_p5)
}
  0x64   :  { %s961_s5 = smov 384   ;;  %s962_s0 = smov 24  }
  0x65   :  { %85 = dma.hbm_to_vmem [thread:$0]  %s1149_s6, 3072, %s1067_s12, [#allocation12], %s961_s5, %s961_s5, %s962_s0  }
  0x66   :  { %943 = dma.done.wait [#allocation3], 128  }
  0x67   :  { %944 = vsyncadd [#allocation3], 4294967168 }
  0x68   :  { %945 = dma.done.wait [#allocation6], 640  }
  0x69   :  { %946 = vsyncadd [#allocation6], 4294966656 }
  0x6a   :  { %947 = dma.done.wait [#allocation9], 1152  }
  0x6b   :  { %948 = vsyncadd [#allocation9], 4294966144 }
  0x6c   :  { %949 = dma.done.wait [#allocation12], 3072  }
  0x6d   :  { %950 = vsyncadd [#allocation12], 4294964224  ;;  %v963_v0 = vmov 0.0   ;;  %vm964_vm0 = vmmov 0   ;;  %v965_v1 = vmov 0.0|0.0   ;;  %vm113_vm1 = vcmask 64512  }
  0x6e   :  { %663 = vmatprep.subr.mxu1 %v963_v0  ;;  %665 = vmatprep.mubr.msk.f32.mxu1 %vm964_vm0, %v963_v0  ;;  %v112_v2 = vld [vmem:[%s1146_s3] sm:$0xff]  ;;  %v107_v3 = vld [vmem:[#allocation5] sm:$0xff]  ;;  %v108_v4 = vld [vmem:[#allocation7] sm:$0xff]  ;;  %vm187_vm2 = vcmask 261120   ;;  %vm269_vm3 = vcmask 523264   ;;  %s966_s9 = smov [#allocation13]  }
  0x6f   :  { %723 = vmatprep.subr.bf16.mxu0 %v965_v1  ;;  %695 = vmatprep.mubr.msk.f32.mxu0 %vm964_vm0, %v963_v0  ;;  %v109_v5 = vld [vmem:[#allocation7 + $0x8] sm:$0xff]  ;;  %v110_v6 = vld [vmem:[#allocation7 + $0x10] sm:$0xff]  ;;  %v111_v7 = vld [vmem:[#allocation7 + $0x18] sm:$0xff]  ;;  %s613_s11 = sshll.u32 %s966_s9, 4  ;;  %s614_s11 = int_to_ptr.vmem [resolvable:$true] %s613_s11 }
  0x70   :  { %664 = vmatpush3.msra.mxu1 %v112_v2  ;;  %v718_v8 = vpack.c.bf16 %v109_v5, %v108_v4  ;;  %v721_v9 = vpack.c.bf16 %v111_v7, %v110_v6  ;;  %v106_v10 = vld [vmem:[#allocation2] sm:$0xff]  ;;  %v627_v14 = vld [vmem:[#allocation8] ss:$0 sm:$0xff]  ;;  %v301_v24 = vld [vmem:[#allocation10] sm:$0xff]  ;;  %s921_s12 = scalar_lea.vmem %s614_s11, 384  ;;  %p926_p7 = scmp.lt.s32.totalorder %s614_s11, %s614_s11 }
  0x71   :  { %666 = vmatmul.mubr.msk.f32.vlgmr.msra.gmra.mrb[0].mxu1 %vm113_vm1, %v107_v3  ;;  %717 = vmatprep.subr.bf16.mxu1 %v965_v1  ;;  %v302_v25 = vld [vmem:[#allocation10 + $0x8] sm:$0xff]  ;;  %v303_v26 = vld [vmem:[#allocation10 + $0x10] sm:$0xff]  ;;  %v304_v28 = vld [vmem:[#allocation10 + $0x18] sm:$0xff]  ;;  %p922_p6 = scmp.ne.s32.totalorder %s614_s11, %s921_s12  ;;  %p927_p8 = scmp.lt.s32.totalorder %s921_s12, %s921_s12 }
  0x72   :  { %676 = vmatprep.mubr.msk.f32.mxu1 %vm964_vm0, %v963_v0  ;;  %719 = vmatpush3.bf16.msra.mxu1 %v718_v8  ;;  %v724_v27 = vpack.c.bf16 %v302_v25, %v301_v24  ;;  %v727_v29 = vpack.c.bf16 %v304_v28, %v303_v26  ;;  %v305_v30 = vld [vmem:[#allocation10 + $0x20] sm:$0xff]  ;;  %v306_v31 = vld [vmem:[#allocation10 + $0x28] sm:$0xff]  ;;  %v307_v33 = vld [vmem:[#allocation10 + $0x30] sm:$0xff] }
  0x73   :  { %720 = vmatprep.subr.bf16.mxu1 %v965_v1  ;;  %v730_v32 = vpack.c.bf16 %v306_v31, %v305_v30  ;;  %v308_v34 = vld [vmem:[#allocation10 + $0x38] sm:$0xff]  ;;  %v420_v60 = vld [vmem:[#allocation11 + $0x8] sm:$0xff]  ;;  %v423_v61 = vld [vmem:[#allocation11 + $0x20] sm:$0xff]  ;;  %p928_p9 = por %p927_p8, %p926_p7 }
  0x74   :  { %725 = vmatpush3.bf16.msra.mxu0 %v724_v27  ;;  %v733_v35 = vpack.c.bf16 %v308_v34, %v307_v33  ;;  %v628_v40 = vld [vmem:[#allocation8 + $0x1] ss:$0 sm:$0xff]  ;;  %v629_v42 = vld [vmem:[#allocation8 + $0x2] ss:$0 sm:$0xff]  ;;  %v631_v50 = vld [vmem:[#allocation8 + $0x3] ss:$0 sm:$0xff]  ;;  %v735_v63 = vpack.c.bf16 %v423_v61, %v420_v60 }
  0x75   :  { %726 = vmatprep.subr.bf16.mxu0 %v965_v1  ;;  %v419_v62 = vld [vmem:[#allocation11] sm:$0xff]  ;;  %v422_v2 = vld [vmem:[#allocation11 + $0x18] sm:$0xff]  ;;  %v424_v3 = vld [vmem:[#allocation11 + $0x28] sm:$0xff]  ;;  %p929_p10 = pnand %p928_p9, %p922_p6 }
  0x76   :  { %722 = vmatpush3.bf16.msra.mxu1 %v721_v9  ;;  %v737_v4 = vpack.c.bf16 %v422_v2, %v419_v62  ;;  %v426_v6 = vld [vmem:[#allocation11 + $0x38] sm:$0xff]  ;;  %v429_v7 = vld [vmem:[#allocation11 + $0x50] sm:$0xff]  ;;  %v440_v28 = vld [vmem:[#allocation11 + $0xa8] sm:$0xff] }
  0x77   :  { %v425_v8 = vld [vmem:[#allocation11 + $0x30] sm:$0xff]  ;;  %736 = vmatprep.subr.bf16.mxu1 %v735_v63  ;;  %v739_v9 = vpack.c.bf16 %v429_v7, %v426_v6  ;;  %v442_v30 = vld [vmem:[#allocation11 + $0xb8] sm:$0xff] }
  0x78   :  { %728 = vmatpush3.bf16.msra.mxu0 %v727_v29  ;;  %v437_v26 = vld [vmem:[#allocation11 + $0x90] sm:$0xff]  ;;  %v439_v29 = vld [vmem:[#allocation11 + $0xa0] sm:$0xff] }
  0x79   :  { %677 = vmatmul.mubr.msk.f32.vlgmr.msra.gmra.mrb[2].mxu1 %vm187_vm2, %v106_v10  ;;  %729 = vmatprep.subr.bf16.mxu0 %v965_v1  ;;  %v428_v10 = vld [vmem:[#allocation11 + $0x48] sm:$0xff]  ;;  %v749_v31 = vpack.c.bf16 %v440_v28, %v437_v26 }
  0x7a   :  { %527 = vmatprep.mubr.f32.mxu1 %v963_v0  ;;  %738 = vmatpush1.bf16.msra.mxu1 %v737_v4 }
  0x7b   :  { %740 = vmatprep.subr.bf16.mxu1 %v739_v9 }
  0x7c   :  { %731 = vmatpush3.bf16.msra.mxu0 %v730_v32  ;;  %v761_v32 = vpack.c.bf16 %v442_v30, %v439_v29 }
  0x7d   :  { %732 = vmatprep.subr.bf16.mxu0 %v965_v1 }
  0x80   :  { %734 = vmatpush3.bf16.msra.mxu0 %v733_v35 }
  0x81   :  { %751 = vmatprep.subr.bf16.mxu0 %v965_v1 }
 0x144   :  { %v183_v11 = vpop.f32.mrb[0].mxu1 }
 0x145   :  { %v667_v12 = vpop.f32.mrb[1].mxu1 }
 0x146   :  { %v430_v12 = vld [vmem:[#allocation11 + $0x58] sm:$0xff] }
 0x14c   :  { %v257_v13 = vpop.f32.mrb[2].mxu1 }
 0x14d   :  { %v258_v15 = vadd.f32 %v257_v13, %v183_v11  ;;  %v678_v16 = vpop.f32.mrb[3].mxu1  ;;  %v427_v11 = vld [vmem:[#allocation11 + $0x40] sm:$0xff]  ;;  %v741_v13 = vpack.c.bf16 %v428_v10, %v425_v8 }
 0x14e   :  { %v435_v16 = vld [vmem:[#allocation11 + $0x80] sm:$0xff] }
 0x14f   :  { %v266_v17 = vadd.f32 %v627_v14, %v258_v15  ;;  %v755_v14 = vpack.c.bf16 %v430_v12, %v427_v11  ;;  %v432_v15 = vld [vmem:[#allocation11 + $0x68] sm:$0xff]  ;;  %742 = vmatpush1.bf16.msra.mxu1 %v741_v13 }
 0x151   :  { %v270_v18 = vsel %vm269_vm3, %v266_v17, 0.0 }
 0x152   :  { %271 = vadd.xlane.f32.xlu0 %v270_v18  ;;  %v743_v18 = vpack.c.bf16 %v435_v16, %v432_v15 }
 0x154   :  { %744 = vmatprep.subr.bf16.mxu1 %v743_v18 }
 0x1df   :  { %v272_v19 = vpop.xlane.xlu0 %271 }
 0x1e0   :  { %v274_v20 = vmul.f32 0.015625, %v272_v19  ;;  %v434_v19 = vld [vmem:[#allocation11 + $0x78] sm:$0xff] }
 0x1e2   :  { %v275_v21 = vsub.f32 %v266_v17, %v274_v20  ;;  %v431_v17 = vld [vmem:[#allocation11 + $0x60] sm:$0xff]  ;;  %v433_v20 = vld [vmem:[#allocation11 + $0x70] sm:$0xff] }
 0x1e3   :  { %v745_v24 = vpack.c.bf16 %v434_v19, %v431_v17 }
 0x1e4   :  { %v276_v22 = vmul.f32 %v275_v21, %v275_v21 }
 0x1e5   :  { %746 = vmatpush1.bf16.msra.mxu1 %v745_v24 }
 0x1e6   :  { %v277_v23 = vsel %vm269_vm3, %v276_v22, 0.0  ;;  %v438_v22 = vld [vmem:[#allocation11 + $0x98] sm:$0xff] }
 0x1e7   :  { %278 = vadd.xlane.f32.xlu0 %v277_v23  ;;  %v441_v23 = vld [vmem:[#allocation11 + $0xb0] sm:$0xff] }
 0x1e8   :  { %v747_v27 = vpack.c.bf16 %v441_v23, %v438_v22 }
 0x1ea   :  { %748 = vmatprep.subr.bf16.mxu1 %v747_v27 }
 0x1eb   :  { %750 = vmatpush1.bf16.msra.mxu1 %v749_v31 }
 0x274   :  { %v279_v36 = vpop.xlane.xlu0 %278 }
 0x275   :  { %v280_v37 = vmul.f32 0.015625, %v279_v36 }
 0x277   :  { %v281_v38 = vadd.f32 0.001, %v280_v37  ;;  %v633_v37 = vld [vmem:[#allocation8 + $0x4] ss:$0 sm:$0xff] }
 0x279   :  { %777 = vrsqrt.f32 %v281_v38 }
 0x283   :  { %v778_v39 = vpop.eup %777 }
 0x284   :  { %v283_v41 = vmul.f32 %v778_v39, %v275_v21  ;;  %v436_v21 = vld [vmem:[#allocation11 + $0x88] sm:$0xff]  ;;  %v634_v39 = vld [vmem:[#allocation8 + $0x5] ss:$0 sm:$0xff] }
 0x285   :  { %v758_v25 = vpack.c.bf16 %v436_v21, %v433_v20 }
 0x286   :  { %v288_v43 = vmul.f32 %v628_v40, %v283_v41 }
 0x288   :  { %v293_v44 = vadd.f32 %v629_v42, %v288_v43 }
 0x28a   :  { %v630_v45 = vmul.f32 -1.442695, %v293_v44 }
 0x28c   :  { %779 = vpow2.f32 %v630_v45 }
 0x296   :  { %v780_v46 = vpop.eup %779 }
 0x297   :  { %v297_v47 = vadd.f32 1.0, %v780_v46 }
 0x299   :  { %781 = vrcp.f32 %v297_v47 }
 0x2a3   :  { %v782_v48 = vpop.eup %781 }
 0x2a4   :  { %v300_v49 = vmul.f32 %v782_v48, %v293_v44 }
 0x2a6   :  { %696 = vmatmul.mubr.msk.f32.vlgmr.msra.gmra.mrb[0].mxu0 %vm269_vm3, %v300_v49 }
 0x2a7   :  { %714 = vmatprep.mubr.msk.f32.mxu0 %vm964_vm0, %v963_v0  ;;  %v421_v0 = vld [vmem:[#allocation11 + $0x10] sm:$0xff] }
 0x2a8   :  { %v752_v5 = vpack.c.bf16 %v424_v3, %v421_v0 }
 0x2aa   :  { %753 = vmatpush3.bf16.msra.mxu0 %v752_v5 }
 0x2ab   :  { %754 = vmatprep.subr.bf16.mxu0 %v965_v1 }
 0x2ae   :  { %756 = vmatpush3.bf16.msra.mxu0 %v755_v14 }
 0x2af   :  { %757 = vmatprep.subr.bf16.mxu0 %v965_v1 }
 0x2b2   :  { %759 = vmatpush3.bf16.msra.mxu0 %v758_v25 }
 0x2b3   :  { %760 = vmatprep.subr.bf16.mxu0 %v965_v1  ;;  %v445_v1 = vlaneseq }
 0x2b5   :  { %v446_v47 = vshrl.u32 %v445_v1, 7 }
 0x2b6   :  { %762 = vmatpush3.bf16.msra.mxu0 %v761_v32 }
 0x2b7   :  { %v447_v48 = vsub.s32 0, %v446_v47  ;;  %v455_v49 = vsub.s32 2, %v446_v47 }
 0x379   :  { %v383_v51 = vpop.f32.mrb[0].mxu0 }
 0x37a   :  { %v384_v52 = vadd.f32 %v631_v50, %v383_v51  ;;  %v697_v53 = vpop.f32.mrb[1].mxu0  ;;  %v443_v50 = vld [vmem:[%s1150_s7] sm:$0x7]  ;;  %v451_v51 = vsub.s32 1, %v446_v47 }
 0x37b   :  { %v456_v53 = vrot.slane %v443_v50, %v455_v49 }
 0x37c   :  { %v389_v54 = vsel %vm269_vm3, %v384_v52, 0.0 }
 0x37d   :  { %390 = vadd.xlane.f32.xlu1 %v389_v54  ;;  %v452_v54 = vrot.slane %v443_v50, %v451_v51 }
 0x40a   :  { %v391_v55 = vpop.xlane.xlu1 %390 }
 0x40b   :  { %v392_v56 = vmul.f32 0.015625, %v391_v55 }
 0x40d   :  { %v393_v57 = vsub.f32 %v384_v52, %v392_v56  ;;  %v448_v52 = vrot.slane %v443_v50, %v447_v48 }
 0x40f   :  { %v394_v58 = vmul.f32 %v393_v57, %v393_v57 }
 0x411   :  { %v395_v59 = vsel %vm269_vm3, %v394_v58, 0.0 }
 0x412   :  { %396 = vadd.xlane.f32.xlu1 %v395_v59 }
 0x49f   :  { %v397_v33 = vpop.xlane.xlu1 %396 }
 0x4a0   :  { %v398_v34 = vmul.f32 0.015625, %v397_v33 }
 0x4a2   :  { %v399_v35 = vadd.f32 0.001, %v398_v34 }
 0x4a4   :  { %783 = vrsqrt.f32 %v399_v35 }
 0x4ae   :  { %v784_v36 = vpop.eup %783 }
 0x4af   :  { %v401_v38 = vmul.f32 %v784_v36, %v393_v57 }
 0x4b1   :  { %v406_v40 = vmul.f32 %v633_v37, %v401_v38 }
 0x4b3   :  { %v411_v41 = vadd.f32 %v634_v39, %v406_v40 }
 0x4b5   :  { %v635_v42 = vmul.f32 -1.442695, %v411_v41 }
 0x4b7   :  { %785 = vpow2.f32 %v635_v42 }
 0x4c1   :  { %v786_v43 = vpop.eup %785 }
 0x4c2   :  { %v415_v44 = vadd.f32 1.0, %v786_v43 }
 0x4c4   :  { %787 = vrcp.f32 %v415_v44 }
 0x4ce   :  { %v788_v45 = vpop.eup %787 }
 0x4cf   :  { %v418_v46 = vmul.f32 %v788_v45, %v411_v41 }
 0x4d1   :  { %636 = vmatmul.mubr.msk.f32.vlgmr.msra.gmra.mrb[4].mxu1 %vm269_vm3, %v418_v46  ;;  %715 = vmatmul.mubr.msk.f32.vlgmr.msra.gmra.mrb[2].mxu0 %vm269_vm3, %v418_v46 }
 0x5a4   :  { %v529_v55 = vpop.f32.mrb[4].mxu1  ;;  %v600_v56 = vpop.f32.mrb[2].mxu0 }
 0x5a5   :  { %v530_v57 = vadd.f32 %v529_v55, %v448_v52  ;;  %v601_v58 = vadd.f32 %v600_v56, %v456_v53  ;;  %v531_v59 = vpop.f32.mrb[5].mxu1  ;;  %v716_v60 = vpop.f32.mrb[3].mxu0 }
 0x5a6   :  { %v532_v61 = vadd.f32 %v531_v59, %v452_v54 }
 0x5a7   :  { %604 = vst [vmem:[#allocation13] sm:$0xff] %v530_v57  ;;  %606 = vst [vmem:[#allocation13 + $0x10] sm:$0xff] %v601_v58 }
 0x5a8   :  { %605 = vst [vmem:[#allocation13 + $0x8] sm:$0xff] %v532_v61 }
 0x5a9   :  { %932 = shalt.err (!%p929_p10)
}
 0x5aa   :  { %s933_s14 = scalar_lea.hbm %s1151_s8, 384 }
 0x5ab   :  { %p934_p11 = scmp.ne.s32.totalorder %s1151_s8, %s933_s14  ;;  %p937_p12 = scmp.lt.u32.totalorder %s933_s14, %s1151_s8 }
 0x5ad   :  { %p939_p13 = pnand %p937_p12, %p934_p11 }
 0x5af   :  { %942 = shalt.err (!%p939_p13)
}
 0x5b0   :  { %616 = dma.vmem_to_hbm [thread:$0]  %s614_s11, 384, %s1151_s8, [#allocation4]  }
 0x5b1   :  { %951 = dma.done.wait [#allocation4], 384  }
 0x5b2   :  { %952 = vsyncadd [#allocation4], 4294966912 }
 0x5b3   :  { %620 = vsyncpa [#allocation3], 1 }
 0x5b4   :  { %621 = vsyncpa [#allocation6], 1 }
 0x5b5   :  { %622 = vsyncpa [#allocation9], 1 }
 0x5b6   :  { %623 = vsyncpa [#allocation12], 1 }
 0x5b7   :  { %624 = vsyncpa [#allocation4], 1 }

</bundles_post_ra>
